<compile_context>
chip_gen: v5e
topology: v5e:2x2
jax: 0.10.0
libtpu: 0.0.40
codegen_flags: <defaults>
</compile_context>

<pallas_src>
import math
import functools

import jax
import jax.numpy as jnp
from jax import lax
from jax.experimental import pallas as pl
from jax.experimental.pallas import tpu as pltpu


def _taylor_exp_kernel(x_ref, o_ref, *, d, out_dim, inv_rrd, inv_r2rd, sub_rows):
    # x_ref: (1, T_TILE, D)        VMEM tile for one (batch*head, t-tile)
    # o_ref: (1, T_TILE, out_dim)  VMEM tile of feature-mapped output, out_dim = 1 + D + D*D
    odt = o_ref.dtype
    t_tile = x_ref.shape[1]

    def process(row0, nrows):
        # One sub-chunk of rows: load once, scale once, emit 128-lane-aligned slabs.
        x = x_ref[0, pl.ds(row0, nrows), :].astype(jnp.float32)   # (nrows, D), f32 math
        x_s2 = x * inv_r2rd                                       # hoisted: x/(sqrt(2)*sqrt(d))

        def x2_pieces(a, b):
            # Pieces covering x2 lanes [a, b), where x2 lane l = x[:, l // d] * x_s2[:, l % d]
            # (row-major m*D + n, identical to the torch flatten order).
            pieces = []
            l = a
            while l < b:
                m, n0 = divmod(l, d)
                n1 = min(d, n0 + (b - l))
                pieces.append(x[:, m:m + 1] * x_s2[:, n0:n1])
                l += n1 - n0
            return pieces

        # Emit the 1 + D + D*D feature row as 128-lane slabs at aligned offsets 0/128/256/...
        for off in range(0, out_dim, 128):
            w = min(128, out_dim - off)
            if off == 0:
                pieces = [jnp.ones((nrows, 1), jnp.float32), x * inv_rrd]
                pieces += x2_pieces(0, w - (1 + d))
            else:
                a = off - (1 + d)
                pieces = x2_pieces(a, a + w)
            slab = pieces[0] if len(pieces) == 1 else jnp.concatenate(pieces, axis=-1)
            o_ref[0, pl.ds(row0, nrows), off:off + w] = slab.astype(odt)

    rows = min(sub_rows, t_tile)
    n_full = t_tile // rows
    rem = t_tile - n_full * rows

    if n_full == 1:
        process(0, rows)
    elif n_full > 1:
        def body(i, carry):
            process(pl.multiple_of(i * rows, rows), rows)
            return carry
        lax.fori_loop(0, n_full, body, 0, unroll=True)
    if rem > 0:
        # Static-size ragged tail (T_TILE not a multiple of sub_rows).
        process(n_full * rows, rem)


def taylor_exp(x, *, t_tile=1024, sub_rows=128, out_dtype=None):
    """Pallas TaylorExp forward.  x: (B, H, T, D) -> (B, H, T, 1 + D + D*D).

    out_dtype: optional override (e.g. jnp.bfloat16) to halve the output writeback when the
    downstream consumer tolerates it; default matches x.dtype (same as the PyTorch module).
    """
    B, H, T, D = x.shape
    assert 1 + D <= 128, "head_dim too large for this slab layout"  # Based uses small D
    out_dim = 1 + D + D * D
    out_dtype = jnp.dtype(x.dtype if out_dtype is None else out_dtype)

    rd = math.sqrt(D)          # sqrt(d)
    rrd = math.sqrt(rd)        # d^(1/4)
    r2 = math.sqrt(2.0)

    # Big sequence tiles to amortize per-grid-step overhead (kernel is HBM-write-bound):
    # 1024 rows * 384 padded lanes * 4 B * 2 buffers ~ 3 MB output VMEM -> fine on all gens.
    # TODO(synk): on v5e only, cap t_tile <= 2048 or raise vmem_limit_bytes if going larger.
    T_TILE = min(t_tile, T)
    nt = pl.cdiv(T, T_TILE)
    BH = B * H
    xr = x.reshape(BH, T, D)   # free reshape (merges leading dims)

    kernel = functools.partial(
        _taylor_exp_kernel,
        d=D,
        out_dim=out_dim,
        inv_rrd=1.0 / rrd,
        inv_r2rd=1.0 / (r2 * rd),
        sub_rows=sub_rows,
    )

    cost = pl.CostEstimate(
        flops=2 * BH * T * D * D,
        transcendentals=0,
        bytes_accessed=BH * T * (D * jnp.dtype(x.dtype).itemsize
                                 + out_dim * out_dtype.itemsize),
    )

    out = pl.pallas_call(
        kernel,
        out_shape=jax.ShapeDtypeStruct((BH, T, out_dim), out_dtype),
        grid=(BH, nt),
        in_specs=[pl.BlockSpec((1, T_TILE, D), lambda b, t: (b, t, 0))],
        out_specs=pl.BlockSpec((1, T_TILE, out_dim), lambda b, t: (b, t, 0)),
        compiler_params=pltpu.CompilerParams(
            dimension_semantics=("parallel", "parallel")),
        cost_estimate=cost,
    )(xr)
    return out.reshape(B, H, T, out_dim)


def taylor_exp_ref(x):
    """Pure-JAX reference matching the PyTorch forward exactly."""
    D = x.shape[-1]
    r2 = math.sqrt(2.0)
    rd = math.sqrt(D)
    rrd = math.sqrt(rd)
    x2 = (x[..., :, None] * x[..., None, :]).reshape(*x.shape[:-1], D * D) / r2
    ones = jnp.ones(x[..., :1].shape, dtype=x.dtype)
    return jnp.concatenate([ones, x / rrd, x2 / rd], axis=-1)


if __name__ == "__main__":
    # TaylorExp has no learned parameters (tril_indices is only used by forward_mem_save,
    # which is not the forward path being reproduced).
    B, H, T, D = 2, 4, 16, 16
    key = jax.random.PRNGKey(0)
    x = jax.random.normal(key, (B, H, T, D), dtype=jnp.float32)

    out = jax.block_until_ready(taylor_exp(x))
    ref = taylor_exp_ref(x)
    assert out.shape == (B, H, T, 1 + D + D * D), out.shape
    assert jnp.allclose(out, ref, atol=1e-5, rtol=1e-5), "mismatch vs reference"

    # Longer + ragged sequence: exercises the tiled-T path (nt=2) and the masked last block.
    T2 = 1300
    x2 = jax.random.normal(jax.random.PRNGKey(1), (1, 2, T2, D), dtype=jnp.float32)
    out2 = jax.block_until_ready(taylor_exp(x2))
    assert jnp.allclose(out2, taylor_exp_ref(x2), atol=1e-5, rtol=1e-5), "mismatch (tiled/ragged T)"

    # Opt-in bf16 output path (f32 math in-kernel, cast at store): looser tolerance.
    out_bf16 = jax.block_until_ready(taylor_exp(x, out_dtype=jnp.bfloat16))
    assert jnp.allclose(out_bf16.astype(jnp.float32), ref, atol=5e-2, rtol=5e-2), \
        "mismatch (bf16 output path)"

    print("KERNEL_OK")
</pallas_src>

<mosaic_0001>
module attributes {stable_mosaic.version = 11 : i64} {
  func.func @_taylor_exp_kernel(%arg0: i32, %arg1: i32, %arg2: memref<1x16x16xf32, #tpu.memory_space<vmem>>, %arg3: memref<1x16x273xf32, #tpu.memory_space<vmem>>) attributes {dimension_semantics = [#tpu.dimension_semantics<parallel>, #tpu.dimension_semantics<parallel>], iteration_bounds = array<i64: 8, 1>, scalar_prefetch = 0 : i64, scratch_operands = 0 : i64, tpu.core_type = #tpu.core_type<tc>, window_params = [{transform_indices = @transform_0, window_bounds = array<i64: 1, 16, 16>}, {transform_indices = @transform_1, window_bounds = array<i64: 1, 16, 273>}]} {
    %c0 = arith.constant 0 : index
    %c0_0 = arith.constant 0 : index
    %c0_1 = arith.constant 0 : index
    %0 = vector.load %arg2[%c0, %c0_0, %c0_1] : memref<1x16x16xf32, #tpu.memory_space<vmem>>, vector<1x16x16xf32>
    %1 = vector.shape_cast %0 : vector<1x16x16xf32> to vector<16x16xf32>
    %cst = arith.constant 0.176776692 : f32
    %2 = vector.broadcast %cst : f32 to vector<16x16xf32>
    %3 = arith.mulf %1, %2 : vector<16x16xf32>
    %cst_2 = arith.constant 1.000000e+00 : f32
    %4 = vector.broadcast %cst_2 : f32 to vector<16x1xf32>
    %cst_3 = arith.constant 5.000000e-01 : f32
    %5 = vector.broadcast %cst_3 : f32 to vector<16x16xf32>
    %6 = arith.mulf %1, %5 : vector<16x16xf32>
    %7 = vector.extract_strided_slice %1 {offsets = [0, 0], sizes = [16, 1], strides = [1, 1]} : vector<16x16xf32> to vector<16x1xf32>
    %8 = vector.broadcast %7 : vector<16x1xf32> to vector<16x16xf32>
    %9 = arith.mulf %8, %3 : vector<16x16xf32>
    %10 = vector.extract_strided_slice %1 {offsets = [0, 1], sizes = [16, 1], strides = [1, 1]} : vector<16x16xf32> to vector<16x1xf32>
    %11 = vector.broadcast %10 : vector<16x1xf32> to vector<16x16xf32>
    %12 = arith.mulf %11, %3 : vector<16x16xf32>
    %13 = vector.extract_strided_slice %1 {offsets = [0, 2], sizes = [16, 1], strides = [1, 1]} : vector<16x16xf32> to vector<16x1xf32>
    %14 = vector.broadcast %13 : vector<16x1xf32> to vector<16x16xf32>
    %15 = arith.mulf %14, %3 : vector<16x16xf32>
    %16 = vector.extract_strided_slice %1 {offsets = [0, 3], sizes = [16, 1], strides = [1, 1]} : vector<16x16xf32> to vector<16x1xf32>
    %17 = vector.broadcast %16 : vector<16x1xf32> to vector<16x16xf32>
    %18 = arith.mulf %17, %3 : vector<16x16xf32>
    %19 = vector.extract_strided_slice %1 {offsets = [0, 4], sizes = [16, 1], strides = [1, 1]} : vector<16x16xf32> to vector<16x1xf32>
    %20 = vector.broadcast %19 : vector<16x1xf32> to vector<16x16xf32>
    %21 = arith.mulf %20, %3 : vector<16x16xf32>
    %22 = vector.extract_strided_slice %1 {offsets = [0, 5], sizes = [16, 1], strides = [1, 1]} : vector<16x16xf32> to vector<16x1xf32>
    %23 = vector.broadcast %22 : vector<16x1xf32> to vector<16x16xf32>
    %24 = arith.mulf %23, %3 : vector<16x16xf32>
    %25 = vector.extract_strided_slice %1 {offsets = [0, 6], sizes = [16, 1], strides = [1, 1]} : vector<16x16xf32> to vector<16x1xf32>
    %26 = vector.extract_strided_slice %3 {offsets = [0, 0], sizes = [16, 15], strides = [1, 1]} : vector<16x16xf32> to vector<16x15xf32>
    %27 = vector.broadcast %25 : vector<16x1xf32> to vector<16x15xf32>
    %28 = arith.mulf %27, %26 : vector<16x15xf32>
    %29 = tpu.concatenate %4, %6, %9, %12, %15, %18, %21, %24, %28 in 1 : vector<16x1xf32>, vector<16x16xf32>, vector<16x16xf32>, vector<16x16xf32>, vector<16x16xf32>, vector<16x16xf32>, vector<16x16xf32>, vector<16x16xf32>, vector<16x15xf32> -> vector<16x128xf32>
    %c0_4 = arith.constant 0 : index
    %c0_5 = arith.constant 0 : index
    %c0_6 = arith.constant 0 : index
    %30 = vector.load %arg3[%c0_4, %c0_5, %c0_6] : memref<1x16x273xf32, #tpu.memory_space<vmem>>, vector<1x16x128xf32>
    %31 = vector.shape_cast %30 : vector<1x16x128xf32> to vector<16x128xf32>
    %32 = vector.shape_cast %29 : vector<16x128xf32> to vector<1x16x128xf32>
    tpu.vector_store %arg3[%c0_4, %c0_5, %c0_6], %32 {strides = array<i32>} : memref<1x16x273xf32, #tpu.memory_space<vmem>>, vector<1x16x128xf32>,
    %33 = vector.extract_strided_slice %1 {offsets = [0, 6], sizes = [16, 1], strides = [1, 1]} : vector<16x16xf32> to vector<16x1xf32>
    %34 = vector.extract_strided_slice %3 {offsets = [0, 15], sizes = [16, 1], strides = [1, 1]} : vector<16x16xf32> to vector<16x1xf32>
    %35 = arith.mulf %33, %34 : vector<16x1xf32>
    %36 = vector.extract_strided_slice %1 {offsets = [0, 7], sizes = [16, 1], strides = [1, 1]} : vector<16x16xf32> to vector<16x1xf32>
    %37 = vector.broadcast %36 : vector<16x1xf32> to vector<16x16xf32>
    %38 = arith.mulf %37, %3 : vector<16x16xf32>
    %39 = vector.extract_strided_slice %1 {offsets = [0, 8], sizes = [16, 1], strides = [1, 1]} : vector<16x16xf32> to vector<16x1xf32>
    %40 = vector.broadcast %39 : vector<16x1xf32> to vector<16x16xf32>
    %41 = arith.mulf %40, %3 : vector<16x16xf32>
    %42 = vector.extract_strided_slice %1 {offsets = [0, 9], sizes = [16, 1], strides = [1, 1]} : vector<16x16xf32> to vector<16x1xf32>
    %43 = vector.broadcast %42 : vector<16x1xf32> to vector<16x16xf32>
    %44 = arith.mulf %43, %3 : vector<16x16xf32>
    %45 = vector.extract_strided_slice %1 {offsets = [0, 10], sizes = [16, 1], strides = [1, 1]} : vector<16x16xf32> to vector<16x1xf32>
    %46 = vector.broadcast %45 : vector<16x1xf32> to vector<16x16xf32>
    %47 = arith.mulf %46, %3 : vector<16x16xf32>
    %48 = vector.extract_strided_slice %1 {offsets = [0, 11], sizes = [16, 1], strides = [1, 1]} : vector<16x16xf32> to vector<16x1xf32>
    %49 = vector.broadcast %48 : vector<16x1xf32> to vector<16x16xf32>
    %50 = arith.mulf %49, %3 : vector<16x16xf32>
    %51 = vector.extract_strided_slice %1 {offsets = [0, 12], sizes = [16, 1], strides = [1, 1]} : vector<16x16xf32> to vector<16x1xf32>
    %52 = vector.broadcast %51 : vector<16x1xf32> to vector<16x16xf32>
    %53 = arith.mulf %52, %3 : vector<16x16xf32>
    %54 = vector.extract_strided_slice %1 {offsets = [0, 13], sizes = [16, 1], strides = [1, 1]} : vector<16x16xf32> to vector<16x1xf32>
    %55 = vector.broadcast %54 : vector<16x1xf32> to vector<16x16xf32>
    %56 = arith.mulf %55, %3 : vector<16x16xf32>
    %57 = vector.extract_strided_slice %1 {offsets = [0, 14], sizes = [16, 1], strides = [1, 1]} : vector<16x16xf32> to vector<16x1xf32>
    %58 = vector.extract_strided_slice %3 {offsets = [0, 0], sizes = [16, 15], strides = [1, 1]} : vector<16x16xf32> to vector<16x15xf32>
    %59 = vector.broadcast %57 : vector<16x1xf32> to vector<16x15xf32>
    %60 = arith.mulf %59, %58 : vector<16x15xf32>
    %61 = tpu.concatenate %35, %38, %41, %44, %47, %50, %53, %56, %60 in 1 : vector<16x1xf32>, vector<16x16xf32>, vector<16x16xf32>, vector<16x16xf32>, vector<16x16xf32>, vector<16x16xf32>, vector<16x16xf32>, vector<16x16xf32>, vector<16x15xf32> -> vector<16x128xf32>
    %c0_7 = arith.constant 0 : index
    %c0_8 = arith.constant 0 : index
    %c128 = arith.constant 128 : index
    %62 = vector.load %arg3[%c0_7, %c0_8, %c128] : memref<1x16x273xf32, #tpu.memory_space<vmem>>, vector<1x16x128xf32>
    %63 = vector.shape_cast %62 : vector<1x16x128xf32> to vector<16x128xf32>
    %64 = vector.shape_cast %61 : vector<16x128xf32> to vector<1x16x128xf32>
    tpu.vector_store %arg3[%c0_7, %c0_8, %c128], %64 {strides = array<i32>} : memref<1x16x273xf32, #tpu.memory_space<vmem>>, vector<1x16x128xf32>,
    %65 = vector.extract_strided_slice %1 {offsets = [0, 14], sizes = [16, 1], strides = [1, 1]} : vector<16x16xf32> to vector<16x1xf32>
    %66 = vector.extract_strided_slice %3 {offsets = [0, 15], sizes = [16, 1], strides = [1, 1]} : vector<16x16xf32> to vector<16x1xf32>
    %67 = arith.mulf %65, %66 : vector<16x1xf32>
    %68 = vector.extract_strided_slice %1 {offsets = [0, 15], sizes = [16, 1], strides = [1, 1]} : vector<16x16xf32> to vector<16x1xf32>
    %69 = vector.broadcast %68 : vector<16x1xf32> to vector<16x16xf32>
    %70 = arith.mulf %69, %3 : vector<16x16xf32>
    %71 = tpu.concatenate %67, %70 in 1 : vector<16x1xf32>, vector<16x16xf32> -> vector<16x17xf32>
    %c0_9 = arith.constant 0 : index
    %c0_10 = arith.constant 0 : index
    %c256 = arith.constant 256 : index
    %72 = vector.load %arg3[%c0_9, %c0_10, %c256] : memref<1x16x273xf32, #tpu.memory_space<vmem>>, vector<1x16x17xf32>
    %73 = vector.shape_cast %72 : vector<1x16x17xf32> to vector<16x17xf32>
    %74 = vector.shape_cast %71 : vector<16x17xf32> to vector<1x16x17xf32>
    tpu.vector_store %arg3[%c0_9, %c0_10, %c256], %74 {strides = array<i32>} : memref<1x16x273xf32, #tpu.memory_space<vmem>>, vector<1x16x17xf32>,
    return
  }
  func.func @transform_0(%arg0: i32, %arg1: i32) -> (i32, i32, i32) {
    %c0_i32 = arith.constant 0 : i32
    %c0_i32_0 = arith.constant 0 : i32
    return %arg0, %arg1, %c0_i32 : i32, i32, i32
  }
  func.func @transform_1(%arg0: i32, %arg1: i32) -> (i32, i32, i32) {
    %c0_i32 = arith.constant 0 : i32
    %c0_i32_0 = arith.constant 0 : i32
    return %arg0, %arg1, %c0_i32 : i32, i32, i32
  }
}

</mosaic_0001>

<bundles_post_ra>
// kernel: tpu_custom_call.1
= control target key start
LH: loop header
LB: loop body
LE: loop exit
PB: predicated region body
PF: predicated region fallthrough
CT: control target
= control target key end

     0   :  { %6 = vsyncpa [#allocation3], 0  ;;  %s1233_s0 = inlined_call_operand.hbm [shape: f32[8,16,16], index: 0, kind: input, shape index: {}]   ;;  %s1234_s1 = inlined_call_operand.hbm [shape: f32[8,16,273], index: 1, kind: output, shape index: {}]  }
   0x1   :  { %8 = vsyncpa [#allocation3 + $0x1], 0 }
   0x2   :  { %9 = vsyncpa [#allocation4], 0 }
   0x3   :  { %11 = vsyncpa [#allocation4 + $0x1], 0  ;;  %s943_s6 = smov 0   ;;  %s945_s7 = smov 0  }
   0x4   :  { %s947_s8 = smov 0   ;;  %s949_s9 = smov 0  }
   0x5   :  { %s951_s10 = smov 0   ;;  %s953_s11 = smov 0  }
   0x6 LB: > { %s649_s12 = sadd.s32 4294967295, %s899_s11   ;;  %s650_s13 = sadd.s32 4294967294, %s899_s11   ;;  %s899_s11 = sphi %s953_s11, %s17_s11   ;;  %s895_s10 = sphi %s951_s10, %s1243_s10   ;;  %s891_s9 = sphi %s949_s9, %s1242_s9   ;;  %s887_s8 = sphi %s947_s8, %s1241_s8   ;;  %s883_s7 = sphi %s945_s7, %s1240_s7   ;;  %s879_s6 = sphi %s943_s6, %s1239_s6  }
   0x7   : > { %s29_s14 = sadd.s32 1, %s895_s10  ;;  %s38_s15 = sadd.s32 1, %s887_s8 }
   0x8   : > { %p31_p0 = scmp.ge.s32.totalorder %s29_s14, 8  ;;  %p45_p1 = scmp.ne.s32.totalorder %s887_s8, %s883_s7 }
   0x9   : > { %p46_p2 = scmp.eq.s32.totalorder %s899_s11, 0  ;;  %p51_p3 = scmp.ne.s32.totalorder %s883_s7, %s879_s6 }
   0xa   : > { %s1245_s14 = smov (%p31_p0, %s29_s14), 0  ;;  %p52_p5 = scmp.eq.s32.totalorder %s649_s12, 0 }
   0xb   : > { %p984_p4 = por %p46_p2, %p45_p1  ;;  %s33_s17 = ssub.s32 %s895_s10, %s1245_s14 }
   0xc   : > { %p77_p6 = scmp.eq.s32.totalorder %s649_s12, 7  ;;  %p36_p7 = scmp.eq.s32.totalorder %s33_s17, 0 }
   0xd   : > { %p990_p8 = por %p52_p5, %p51_p3  ;;  %p83_p10 = scmp.eq.s32.totalorder %s650_s13, 7 }
   0xe   : > { %p994_p9 = por %p77_p6, %p45_p1  ;;  %p676_p12 = scmp.lt.s32.totalorder %s899_s11, 8 }
   0xf   : > { %s999_s20 = scalar_select %p36_p7, %s887_s8, %s38_s15  }
  0x10   : > { %p1001_p11 = por %p83_p10, %p51_p3  ;;  %s103_s22 = sand.u32 1, %s887_s8  }
  0x11   : > { %s653_s23 = sshll.u32 %s103_s22, 4  ;;  %s661_s24 = sshll.u32 %s895_s10, 4 }
  0x12   : > { %s114_s27 = scalar_lea.hbm %s1233_s0, %s661_s24  ;;  %s107_s28 = scalar_lea.vmem [#allocation2], %s653_s23 }
  0x13   : > { %s117_s29 = sshll.u32 %s107_s28, 4  ;;  %s115_s30 = sshll.u32 %s114_s27, 4  ;;  %s118_s29 = int_to_ptr.vmem [resolvable:$true] %s117_s29  ;;  %s116_s30 = int_to_ptr.hbm [resolvable:$true] %s115_s30 }
  0x14   : > { %p669_p13 = pnand %p676_p12, %p984_p4  ;;  %p656_p0 = scmp.ge.s32.totalorder %s899_s11, 1 }
  0x15   : > { %s104_s2 = scalar_lea.sflag [#allocation3], %s103_s22  ;;  %s901_s3 = smov 128  }
  0x16   : > { %s902_s4 = smov 8   ;;  %p125_p1 = scmp.lt.s32.totalorder %s899_s11, 9 }
  0x17   : > { %671 = dma.hbm_to_vmem [thread:$0]  (!%p669_p13), %s116_s30, 256, %s118_s29, %s104_s2, %s901_s3, %s901_s3, %s902_s4  }
  0x18   : > { %p126_p2 = pnand %p656_p0, %p125_p1 }
  0x19   : > { %s1016_s5 = sand.u32 (!%p126_p2), 1, %s883_s7  }
  0x1a   : > { %129 = sbr.rel (%p126_p2) target bundleno = 454 (0x1c6), region = 24  ;;  %s657_s12 = sshll.u32 (!%p126_p2), %s1016_s5, 4 }
  0x1b   : > { %s132_s13 = scalar_lea.sflag (!%p126_p2), [#allocation3], %s1016_s5  ;;  %s135_s15 = scalar_lea.vmem (!%p126_p2), [#allocation2], %s657_s12 }
  0x1f   : > { %870 = dma.done.wait (%p990_p8), %s132_s13, 256  }
  0x20   : > { %872 = vsyncadd (%p990_p8), %s132_s13, 4294967040  ;;  %v903_v0 = vmov 1   ;;  %v904_v1 = vmov 0   ;;  %v905_v2 = vmov 2   ;;  %v1024_v3 = vld [vmem:[%s135_s15] sm:$0xff]  ;;  %v1029_v4 = vld [vmem:[%s135_s15 + $0x8] sm:$0xff] }
  0x21   : > { %759 = vset.pattern.permute.xlu1 %v903_v0  ;;  %758 = vset.pattern.permute.xlu0 %v904_v1  ;;  %v906_v5 = vmov 3   ;;  %v907_v6 = vmov 4   ;;  %v908_v7 = vmov 5   ;;  %v1041_v8 = vmul.f32 0.17677669, %v1029_v4  ;;  %s910_s16 = smov 119  }
  0x22   : > { %760 = vset.pattern.permute.xlu2 %v905_v2  ;;  %176 = vperm.xlu1 %759, %v1024_v3   ;;  %v909_v9 = vmov 6   ;;  %v911_v10 = vmov 8   ;;  %v161_v11 = vmul.f32 0.5, %v1024_v3  ;;  %v162_v12 = vmul.f32 0.5, %v1029_v4  ;;  %s912_s17 = smov 1   ;;  %s918_s18 = smov 33  }
  0x23   : > { %165 = vperm.xlu0 %758, %v1024_v3   ;;  %186 = vperm.xlu2 %760, %v1024_v3   ;;  %v913_v13 = vmov 7   ;;  %v1052_v14 = vmul.f32 0.17677669, %v1024_v3  ;;  %v914_v15 = vmov 10   ;;  %v915_v16 = vmov 9   ;;  %s919_s22 = smov 17  }
  0x24   : > { %v916_v17 = vmov 11   ;;  %v917_v18 = vmov 12   ;;  %s920_s23 = smov 49   ;;  %v921_v32 = vmov 13   ;;  %s922_s24 = smov 81   ;;  %v924_v39 = vmov 14  }
  0x25   : > { %s923_s25 = smov 65   ;;  %s925_s26 = smov 97   ;;  %v928_v54 = vmov 15   ;;  %vm299_vm0 = vcmask 7168   ;;  %vm302_vm1 = vcmask 138240   ;;  %vm305_vm2 = vcmask 269312  }
  0x26   : > { %s926_s27 = smov 113   ;;  %s927_s28 = smov 122   ;;  %vm308_vm3 = vcmask 400384   ;;  %vm311_vm4 = vcmask 531456   ;;  %vm314_vm5 = vcmask 662528   ;;  %vm320_vm6 = vcmask 924672  }
  0x27   : > { %s929_s29 = smov 127   ;;  %s662_s30 = smul.u32 48, %s1016_s5  ;;  %vm317_vm7 = vcmask 793600  }
  0x28   : > { %s930_s3 = smov 114   ;;  %s663_s4 = smul.u32 48, %s891_s9 }
  0x29   : > { %s1153_s2 = scalar_lea.vmem [#allocation5], %s662_s30  ;;  %s544_s9 = scalar_lea.sflag [#allocation4], %s1016_s5 }
  0x2a   : > { %180 = vperm.xlu1 %759, %v1029_v4   ;;  %s558_s15 = scalar_lea.hbm %s1234_s1, %s663_s4 }
  0x2b   : > { %170 = vperm.xlu0 %758, %v1029_v4   ;;  %190 = vperm.xlu2 %760, %v1029_v4  }
  0x32   : > { %762 = vset.pattern.permute.xlu1 %v906_v5 }
  0x33   : > { %761 = vset.pattern.permute.xlu0 %v906_v5  ;;  %200 = vperm.xlu1 %762, %v1029_v4  }
  0x34   : > { %196 = vperm.xlu0 %761, %v1024_v3   ;;  %763 = vset.pattern.permute.xlu2 %v907_v6 }
  0x35   : > { %206 = vperm.xlu2 %763, %v1024_v3  }
  0x3b   : > { %764 = vset.pattern.permute.xlu1 %v907_v6 }
  0x3c   : > { %766 = vset.pattern.permute.xlu0 %v908_v7  ;;  %210 = vperm.xlu1 %764, %v1029_v4  }
  0x3d   : > { %220 = vperm.xlu0 %766, %v1029_v4   ;;  %765 = vset.pattern.permute.xlu2 %v908_v7 }
  0x3e   : > { %216 = vperm.xlu2 %765, %v1024_v3  }
  0x44   : > { %767 = vset.pattern.permute.xlu1 %v909_v9 }
  0x45   : > { %329 = vrot.lane.b32.xlu0 %v1041_v8, %s910_s16  ;;  %226 = vperm.xlu1 %767, %v1024_v3  }
  0x46   : > { %771 = vset.pattern.permute.xlu0 %v911_v10  ;;  %768 = vset.pattern.permute.xlu2 %v909_v9 }
  0x47   : > { %230 = vperm.xlu2 %768, %v1029_v4  }
  0x4d   : > { %346 = vperm.xlu0 %771, %v1024_v3   ;;  %237 = vrot.lane.b32.xlu1 %v161_v11, %s912_s17 }
  0x4e   : > { %769 = vset.pattern.permute.xlu1 %v913_v13 }
  0x4f   : > { %239 = vrot.lane.b32.xlu2 %v162_v12, %s912_s17 }
  0x50   : > { %770 = vset.pattern.permute.xlu2 %v913_v13 }
  0x55   : > { %776 = vset.pattern.permute.xlu0 %v914_v15  ;;  %336 = vperm.xlu1 %769, %v1024_v3  }
  0x56   : > { %370 = vperm.xlu0 %776, %v1029_v4  }
  0x57   : > { %327 = vrot.lane.b32.xlu2 %v1052_v14, %s910_s16  ;;  %s559_s16 = sshll.u32 %s1153_s2, 4  ;;  %s560_s16 = int_to_ptr.vmem [resolvable:$true] %s559_s16 }
  0x5d   : > { %772 = vset.pattern.permute.xlu1 %v911_v10 }
  0x5e   : > { %350 = vperm.xlu1 %772, %v1029_v4   ;;  %781 = vset.pattern.permute.xlu0 %v921_v32 }
  0x5f   : > { %340 = vperm.xlu2 %770, %v1029_v4  }
  0x66   : > { %774 = vset.pattern.permute.xlu1 %v915_v16 }
  0x67   : > { %773 = vset.pattern.permute.xlu2 %v915_v16  ;;  %360 = vperm.xlu1 %774, %v1029_v4  }
  0x68   : > { %356 = vperm.xlu2 %773, %v1024_v3  }
  0x6f   : > { %777 = vset.pattern.permute.xlu1 %v916_v17 }
  0x70   : > { %775 = vset.pattern.permute.xlu2 %v914_v15  ;;  %376 = vperm.xlu1 %777, %v1024_v3  }
  0x71   : > { %366 = vperm.xlu2 %775, %v1024_v3  }
  0x78   : > { %779 = vset.pattern.permute.xlu1 %v917_v18 }
  0x79   : > { %778 = vset.pattern.permute.xlu2 %v916_v17  ;;  %386 = vperm.xlu1 %779, %v1024_v3  }
  0x7a   : > { %380 = vperm.xlu2 %778, %v1029_v4  }
  0x7d   : > { %v187_v19 = vpop.permute.xlu2 %186 }
  0x7e   : > { %v193_v35 = vmul.f32 %v187_v19, %v1052_v14 }
  0x81   : > { %782 = vset.pattern.permute.xlu1 %v921_v32 }
  0x82   : > { %780 = vset.pattern.permute.xlu2 %v917_v18 }
  0x83   : > { %390 = vperm.xlu2 %780, %v1029_v4  }
  0x85   : > { %v191_v20 = vpop.permute.xlu2 %190 }
  0x86   : > { %v194_v29 = vmul.f32 %v191_v20, %v1041_v8 }
  0x8b   : > { %783 = vset.pattern.permute.xlu2 %v924_v39 }
  0x8f   : > { %v207_v21 = vpop.permute.xlu2 %206 }
  0x90   : > { %v213_v34 = vmul.f32 %v207_v21, %v1052_v14 }
  0x94   : > { %v177_v22 = vpop.permute.xlu1 %176 }
  0x95   : > { %v166_v23 = vpop.permute.xlu0 %165  ;;  %v183_v24 = vmul.f32 %v177_v22, %v1052_v14 }
  0x96   : > { %v173_v25 = vmul.f32 %v166_v23, %v1052_v14 }
  0x97   : > { %253 = vrot.lane.b32.xlu2 %v183_v24, %s918_s18 }
  0x98   : > { %245 = vrot.lane.b32.xlu0 %v173_v25, %s919_s22  ;;  %v217_v26 = vpop.permute.xlu2 %216 }
  0x99   : > { %v223_v46 = vmul.f32 %v217_v26, %v1052_v14 }
  0x9c   : > { %v181_v27 = vpop.permute.xlu1 %180 }
  0x9d   : > { %v171_v28 = vpop.permute.xlu0 %170  ;;  %v184_v30 = vmul.f32 %v181_v27, %v1041_v8 }
  0x9e   : > { %v174_v31 = vmul.f32 %v171_v28, %v1041_v8 }
  0x9f   : > { %263 = vrot.lane.b32.xlu2 %v194_v29, %s920_s23 }
  0xa0   : > { %247 = vrot.lane.b32.xlu1 %v174_v31, %s919_s22  ;;  %255 = vrot.lane.b32.xlu0 %v184_v30, %s918_s18 }
  0xa1   : > { %v231_v33 = vpop.permute.xlu2 %230 }
  0xa2   : > { %v234_v50 = vmul.f32 %v231_v33, %v1041_v8 }
  0xa5   : > { %v201_v37 = vpop.permute.xlu1 %200 }
  0xa6   : > { %v197_v36 = vpop.permute.xlu0 %196  ;;  %v204_v40 = vmul.f32 %v201_v37, %v1041_v8 }
  0xa7   : > { %v203_v38 = vmul.f32 %v197_v36, %v1052_v14  ;;  %277 = vrot.lane.b32.xlu2 %v213_v34, %s922_s24 }
  0xa8   : > { %261 = vrot.lane.b32.xlu1 %v193_v35, %s920_s23 }
  0xa9   : > { %269 = vrot.lane.b32.xlu0 %v203_v38, %s923_s25  ;;  %v1083_v41 = vpop.permute.xlu2 %239 }
  0xaa   : > { %v301_v34 = vsel %vm299_vm0, 1.0, %v1083_v41 }
  0xae   : > { %v211_v42 = vpop.permute.xlu1 %210 }
  0xaf   : > { %v221_v43 = vpop.permute.xlu0 %220  ;;  %v214_v44 = vmul.f32 %v211_v42, %v1041_v8 }
  0xb0   : > { %271 = vrot.lane.b32.xlu1 %v204_v40, %s923_s25  ;;  %v224_v45 = vmul.f32 %v221_v43, %v1041_v8 }
  0xb1   : > { %279 = vrot.lane.b32.xlu0 %v214_v44, %s922_s24  ;;  %v328_v47 = vpop.permute.xlu2 %327 }
  0xb2   : > { %287 = vrot.lane.b32.xlu2 %v224_v45, %s925_s26  ;;  %v333_v51 = vmul.f32 %v328_v47, %v1024_v3 }
  0xb7   : > { %v227_v48 = vpop.permute.xlu1 %226  ;;  %v330_v56 = vpop.permute.xlu0 %329 }
  0xb8   : > { %285 = vrot.lane.b32.xlu1 %v223_v46, %s925_s26  ;;  %v233_v49 = vmul.f32 %v227_v48, %v1052_v14  ;;  %v334_v1 = vmul.f32 %v330_v56, %v1029_v4 }
  0xb9   : > { %v341_v52 = vpop.permute.xlu2 %340 }
  0xba   : > { %406 = vperm.xlu2 %783, %v1024_v3   ;;  %293 = vrot.lane.b32.xlu0 %v233_v49, %s926_s27  ;;  %v344_v7 = vmul.f32 %v341_v52, %v1041_v8 }
  0xbf   : > { %v1098_v53 = vpop.permute.xlu1 %237  ;;  %v347_v60 = vpop.permute.xlu0 %346 }
  0xc0   : > { %295 = vrot.lane.b32.xlu1 %v234_v50, %s926_s27  ;;  %v353_v62 = vmul.f32 %v347_v60, %v1052_v14  ;;  %v300_v31 = vsel %vm299_vm0, 1.0, %v1098_v53 }
  0xc2   : > { %417 = vrot.lane.b32.xlu2 %v333_v51, %s927_s28  ;;  %396 = vperm.xlu0 %781, %v1024_v3   ;;  %v357_v57 = vpop.permute.xlu2 %356 }
  0xc3   : > { %785 = vset.pattern.permute.xlu2 %v928_v54  ;;  %v363_v13 = vmul.f32 %v357_v57, %v1052_v14 }
  0xc7   : > { %v337_v55 = vpop.permute.xlu1 %336 }
  0xc8   : > { %400 = vperm.xlu1 %782, %v1029_v4   ;;  %v343_v58 = vmul.f32 %v337_v55, %v1052_v14  ;;  %v371_v17 = vpop.permute.xlu0 %370 }
  0xc9   : > { %v374_v18 = vmul.f32 %v371_v17, %v1041_v8 }
  0xca   : > { %514 = vperm.xlu2 %785, %v1024_v3   ;;  %505 = vrot.lane.b32.xlu0 %v1052_v14, %s929_s29 }
  0xcb   : > { %786 = vset.pattern.permute.xlu0 %v928_v54  ;;  %v367_v61 = vpop.permute.xlu2 %366 }
  0xcc   : > { %v373_v6 = vmul.f32 %v367_v61, %v1052_v14 }
  0xd0   : > { %784 = vset.pattern.permute.xlu1 %v924_v39  ;;  %v351_v59 = vpop.permute.xlu1 %350 }
  0xd1   : > { %410 = vperm.xlu1 %784, %v1029_v4   ;;  %v354_v63 = vmul.f32 %v351_v59, %v1041_v8 }
  0xd2   : > { %425 = vrot.lane.b32.xlu2 %v343_v58, %s912_s17  ;;  %518 = vperm.xlu0 %786, %v1029_v4  }
  0xd4   : > { %v381_v2 = vpop.permute.xlu2 %380 }
  0xd5   : > { %v384_v11 = vmul.f32 %v381_v2, %v1041_v8 }
  0xd9   : > { %507 = vrot.lane.b32.xlu1 %v1041_v8, %s929_s29  ;;  %v361_v0 = vpop.permute.xlu1 %360 }
  0xda   : > { %433 = vrot.lane.b32.xlu2 %v353_v62, %s919_s22  ;;  %435 = vrot.lane.b32.xlu0 %v354_v63, %s919_s22  ;;  %v364_v5 = vmul.f32 %v361_v0, %v1041_v8 }
  0xdd   : > { %v391_v12 = vpop.permute.xlu2 %390 }
  0xde   : > { %v394_v15 = vmul.f32 %v391_v12, %v1041_v8 }
  0xe1   : > { %419 = vrot.lane.b32.xlu1 %v334_v1, %s927_s28 }
  0xe2   : > { %443 = vrot.lane.b32.xlu2 %v364_v5, %s918_s18  ;;  %449 = vrot.lane.b32.xlu0 %v373_v6, %s920_s23  ;;  %v377_v9 = vpop.permute.xlu1 %376 }
  0xe3   : > { %v383_v10 = vmul.f32 %v377_v9, %v1052_v14 }
  0xe9   : > { %427 = vrot.lane.b32.xlu1 %v344_v7, %s912_s17 }
  0xea   : > { %457 = vrot.lane.b32.xlu2 %v383_v10, %s923_s25  ;;  %459 = vrot.lane.b32.xlu0 %v384_v11, %s923_s25  ;;  %s837_s25 = scalar_lea.hbm %s1234_s1, 384 }
  0xeb   : > { %v387_v19 = vpop.permute.xlu1 %386 }
  0xec   : > { %v393_v21 = vmul.f32 %v387_v19, %v1052_v14 }
  0xf1   : > { %441 = vrot.lane.b32.xlu1 %v363_v13, %s918_s18  ;;  %v254_v16 = vpop.permute.xlu2 %253 }
  0xf2   : > { %467 = vrot.lane.b32.xlu2 %v394_v15, %s922_s24 }
  0xf9   : > { %451 = vrot.lane.b32.xlu1 %v374_v18, %s920_s23  ;;  %v264_v20 = vpop.permute.xlu2 %263 }
 0x101   : > { %465 = vrot.lane.b32.xlu1 %v393_v21, %s922_s24  ;;  %v278_v22 = vpop.permute.xlu2 %277 }
 0x10a   : > { %v246_v23 = vpop.permute.xlu0 %245 }
 0x10b   : > { %v303_v32 = vsel %vm302_vm1, %v300_v31, %v246_v23 }
 0x10c   : > { %v288_v24 = vpop.permute.xlu2 %287  ;;  %v306_v37 = vsel %vm305_vm2, %v303_v32, %v254_v16 }
 0x112   : > { %v248_v25 = vpop.permute.xlu1 %247  ;;  %v256_v26 = vpop.permute.xlu0 %255 }
 0x113   : > { %v304_v36 = vsel %vm302_vm1, %v301_v34, %v248_v25 }
 0x114   : > { %v407_v27 = vpop.permute.xlu2 %406  ;;  %v307_v39 = vsel %vm305_vm2, %v304_v36, %v256_v26 }
 0x115   : > { %v413_v28 = vmul.f32 %v407_v27, %v1052_v14  ;;  %v310_v43 = vsel %vm308_vm3, %v307_v39, %v264_v20 }
 0x117   : > { %481 = vrot.lane.b32.xlu2 %v413_v28, %s926_s27 }
 0x11a   : > { %v262_v29 = vpop.permute.xlu1 %261 }
 0x11b   : > { %v270_v30 = vpop.permute.xlu0 %269  ;;  %v309_v38 = vsel %vm308_vm3, %v306_v37, %v262_v29 }
 0x11c   : > { %v312_v40 = vsel %vm311_vm4, %v309_v38, %v270_v30  ;;  %v418_v57 = vpop.permute.xlu2 %417 }
 0x11d   : > { %v315_v44 = vsel %vm314_vm5, %v312_v40, %v278_v22 }
 0x122   : > { %v272_v33 = vpop.permute.xlu1 %271 }
 0x123   : > { %v280_v35 = vpop.permute.xlu0 %279  ;;  %v313_v41 = vsel %vm311_vm4, %v310_v43, %v272_v33 }
 0x124   : > { %v316_v48 = vsel %vm314_vm5, %v313_v41, %v280_v35  ;;  %v515_v62 = vpop.permute.xlu2 %514 }
 0x125   : > { %v319_v50 = vsel %vm317_vm7, %v316_v48, %v288_v24  ;;  %v521_v0 = vmul.f32 %v515_v62, %v1052_v14 }
 0x12a   : > { %v286_v42 = vpop.permute.xlu1 %285 }
 0x12b   : > { %v318_v45 = vsel %vm317_vm7, %v315_v44, %v286_v42 }
 0x12c   : > { %v294_v46 = vpop.permute.xlu0 %293 }
 0x12d   : > { %v321_v47 = vsel %vm320_vm6, %v318_v45, %v294_v46 }
 0x12e   : > { %323 = vst [vmem:[%s1153_s2] sm:$0xff] %v321_v47 }
 0x132   : > { %v296_v49 = vpop.permute.xlu1 %295 }
 0x133   : > { %v322_v51 = vsel %vm320_vm6, %v319_v50, %v296_v49 }
 0x134   : > { %324 = vst [vmem:[%s1153_s2 + $0x18] sm:$0xff] %v322_v51  ;;  %v397_v52 = vpop.permute.xlu0 %396 }
 0x135   : > { %v403_v53 = vmul.f32 %v397_v52, %v1052_v14 }
 0x137   : > { %473 = vrot.lane.b32.xlu0 %v403_v53, %s925_s26 }
 0x13a   : > { %v401_v54 = vpop.permute.xlu1 %400 }
 0x13b   : > { %v404_v55 = vmul.f32 %v401_v54, %v1041_v8 }
 0x13c   : > { %v506_v56 = vpop.permute.xlu0 %505 }
 0x13d   : > { %475 = vrot.lane.b32.xlu1 %v404_v55, %s925_s26  ;;  %v511_v58 = vmul.f32 %v506_v56, %v1024_v3  ;;  %v426_v3 = vpop.permute.xlu2 %425 }
 0x13e   : > { %v487_v14 = vsel %vm299_vm0, %v418_v57, %v426_v3 }
 0x143   : > { %v411_v59 = vpop.permute.xlu1 %410 }
 0x144   : > { %v414_v60 = vmul.f32 %v411_v59, %v1041_v8  ;;  %v519_v61 = vpop.permute.xlu0 %518 }
 0x145   : > { %525 = vrot.lane.b32.xlu1 %v511_v58, %s930_s3  ;;  %v522_v63 = vmul.f32 %v519_v61, %v1041_v8  ;;  %v434_v6 = vpop.permute.xlu2 %433 }
 0x146   : > { %483 = vrot.lane.b32.xlu0 %v414_v60, %s926_s27 }
 0x14b   : > { %v508_v1 = vpop.permute.xlu1 %507 }
 0x14c   : > { %v512_v2 = vmul.f32 %v508_v1, %v1029_v4  ;;  %v436_v9 = vpop.permute.xlu0 %435  ;;  %v489_v4 = vsel %vm302_vm1, %v487_v14, %v434_v6 }
 0x14d   : > { %535 = vrot.lane.b32.xlu1 %v522_v63, %s912_s17  ;;  %v444_v10 = vpop.permute.xlu2 %443 }
 0x14e   : > { %533 = vrot.lane.b32.xlu0 %v521_v0, %s912_s17  ;;  %527 = vrot.lane.b32.xlu2 %v512_v2, %s930_s3  ;;  %s561_s17 = sshll.u32 %s558_s15, 4  ;;  %s562_s17 = int_to_ptr.hbm [resolvable:$true] %s561_s17 }
 0x14f   : > { %s831_s18 = sshra.s32 %s562_s17, 4  ;;  %s832_s18 = int_to_ptr.hbm [resolvable:$true] %s831_s18 }
 0x150   : > { %s833_s22 = scalar_lea.hbm %s832_s18, 48  ;;  %p838_p6 = scmp.lt.s32.totalorder %s832_s18, %s1234_s1 }
 0x151   : > { %p834_p3 = scmp.ne.s32.totalorder %s832_s18, %s833_s22  ;;  %p839_p7 = scmp.lt.s32.totalorder %s837_s25, %s833_s22 }
 0x153   : > { %v420_v5 = vpop.permute.xlu1 %419  ;;  %p835_p4 = pnand %p834_p3, %p994_p9  ;;  %p840_p8 = por %p839_p7, %p838_p6 }
 0x154   : > { %v450_v12 = vpop.permute.xlu0 %449 }
 0x155   : > { %v458_v13 = vpop.permute.xlu2 %457  ;;  %p836_p5 = pneg %p835_p4 }
 0x157   : > { %p841_p10 = pnand %p840_p8, %p836_p5 }
 0x15b   : > { %v428_v7 = vpop.permute.xlu1 %427 }
 0x15c   : > { %v460_v15 = vpop.permute.xlu0 %459  ;;  %v488_v21 = vsel %vm299_vm0, %v420_v5, %v428_v7 }
 0x15d   : > { %v468_v17 = vpop.permute.xlu2 %467  ;;  %v490_v27 = vsel %vm302_vm1, %v488_v21, %v436_v9 }
 0x15e   : > { %v492_v29 = vsel %vm305_vm2, %v490_v27, %v444_v10 }
 0x163   : > { %v442_v11 = vpop.permute.xlu1 %441 }
 0x164   : > { %v491_v16 = vsel %vm305_vm2, %v489_v4, %v442_v11 }
 0x165   : > { %v493_v18 = vsel %vm308_vm3, %v491_v16, %v450_v12 }
 0x166   : > { %v495_v20 = vsel %vm311_vm4, %v493_v18, %v458_v13 }
 0x16b   : > { %v452_v8 = vpop.permute.xlu1 %451 }
 0x16c   : > { %v494_v30 = vsel %vm308_vm3, %v492_v29, %v452_v8 }
 0x16d   : > { %v496_v31 = vsel %vm311_vm4, %v494_v30, %v460_v15 }
 0x16e   : > { %v498_v32 = vsel %vm314_vm5, %v496_v31, %v468_v17 }
 0x171   : > { %v482_v24 = vpop.permute.xlu2 %481 }
 0x173   : > { %v466_v19 = vpop.permute.xlu1 %465 }
 0x174   : > { %v497_v22 = vsel %vm314_vm5, %v495_v20, %v466_v19 }
 0x1a8   : > { %v528_v37 = vpop.permute.xlu2 %527 }
 0x1a9   : > { %v474_v23 = vpop.permute.xlu0 %473 }
 0x1aa   : > { %v499_v25 = vsel %vm317_vm7, %v497_v22, %v474_v23 }
 0x1ab   : > { %v501_v26 = vsel %vm320_vm6, %v499_v25, %v482_v24 }
 0x1ac   : > { %503 = vst [vmem:[%s1153_s2 + $0x8] sm:$0xff] %v501_v26 }
 0x1af   : > { %v476_v28 = vpop.permute.xlu1 %475 }
 0x1b0   : > { %v500_v34 = vsel %vm317_vm7, %v498_v32, %v476_v28 }
 0x1b7   : > { %v526_v33 = vpop.permute.xlu1 %525 }
 0x1b8   : > { %v484_v35 = vpop.permute.xlu0 %483 }
 0x1b9   : > { %v502_v36 = vsel %vm320_vm6, %v500_v34, %v484_v35 }
 0x1ba   : > { %504 = vst [vmem:[%s1153_s2 + $0x20] sm:$0xff] %v502_v36 }
 0x1bf   : > { %v536_v38 = vpop.permute.xlu1 %535 }
 0x1c0   : > { %v540_v39 = vsel %vm299_vm0, %v528_v37, %v536_v38  ;;  %v534_v40 = vpop.permute.xlu0 %533 }
 0x1c1   : > { %542 = vst.msk [vmem:[%s1153_s2 + $0x28] sm:$0xff] %vm302_vm1, %v540_v39  ;;  %v539_v42 = vsel %vm299_vm0, %v526_v33, %v534_v40 }
 0x1c2   : > { %541 = vst.msk [vmem:[%s1153_s2 + $0x10] sm:$0xff] %vm302_vm1, %v539_v42 }
 0x1c3   : > { %844 = shalt.err (!%p841_p10)
}
 0x1c4   : > { %s931_s5 = smov 384   ;;  %s932_s28 = smov 24  }
 0x1c5   : > { %666 = dma.vmem_to_hbm [thread:$0]  (%p994_p9), %s560_s16, 768, %s562_s17, %s544_s9, %s931_s5, %s931_s5, %s932_s28  }
 0x1c6 PF: > { %p677_p12 = scmp.ge.s32.totalorder %s899_s11, 2  ;;  %s576_s29 = sand.u32 1, %s879_s6  }
 0x1c7   : > { %s577_s30 = scalar_lea.sflag [#allocation4], %s576_s29 }
 0x1c8   : > { %p673_p13 = pnand %p677_p12, %p1001_p11 }
 0x1ca   : > { %p674_p0 = pneg %p673_p13 }
 0x1cc   : > { %874 = dma.done.wait (%p674_p0), %s577_s30, 768  }
 0x1cd   : > { %876 = vsyncadd (%p674_p0), %s577_s30, 4294966528  ;;  %s17_s11 = sadd.s32 1, %s899_s11   ;;  %s1239_s6 = smov %s883_s7 }
 0x1ce   : > { %p14_p1 = scmp.ge.s32.totalorder %s17_s11, 10   ;;  %s1240_s7 = smov %s887_s8 }
 0x1cf   : > { %s1241_s8 = smov %s999_s20  ;;  %s1242_s9 = smov %s895_s10 }
 0x1d0   : > { %s1243_s10 = smov %s1245_s14  ;;  %16 = sbr.rel (!%p14_p1) target bundleno = 6 (0x6), region = 69 }
 0x1d5   :  { %583 = vsyncpa [#allocation3], 1 }
 0x1d6   :  { %585 = vsyncpa [#allocation3 + $0x1], 1 }
 0x1d7   :  { %586 = vsyncpa [#allocation4], 1 }
 0x1d8   :  { %588 = vsyncpa [#allocation4 + $0x1], 1 }

</bundles_post_ra>
